<compile_context>
chip_gen: v5e
topology: v5e:2x2
jax: 0.10.0
libtpu: 0.0.40
codegen_flags: <defaults>
</compile_context>

<pallas_src>
import functools
import math

import jax
import jax.numpy as jnp
from jax import lax
from jax.experimental import pallas as pl
from jax.experimental.pallas import tpu as pltpu

HIDB = 1
HIDD = 10
HIDW = 32

LANE = 128


def _round_up(x, m):
    return (x + m - 1) // m * m


def _pick_chunk(npad):
    """Largest lane-chunk in {512,384,256,128} that divides the padded width."""
    for t in (512, 384, 256, 128):
        if npad % t == 0:
            return min(t, npad)
    return npad


# ---------------------------------------------------------------------------
# Fused kernel: all hidden GraphConv(relu) layers of all branches plus the
# per-branch 2-class log_softmax heads, executed in a single invocation with
# everything VMEM-resident.
# ---------------------------------------------------------------------------
def _gcn_fused_kernel(adjT_ref, xT_ref, wf0_ref, wf1_ref, wr0_ref, wr1_ref,
                      wh0_ref, wh1_ref, o_ref, buf_a, buf_b,
                      *, n_rest, n_chunks, tc, n_branch, hp):
    def run_layer(src_ref, dst_ref, w0, w1, is_head):
        """One GraphConv layer, processed in lane chunks.

        For each chunk of node columns:
          ax = h @ adjT[:, chunk]                      (adjacency GEMM, K=Npad)
          s  = w0 @ h[:, chunk] + w1 @ ax              (weight GEMMs, K=F)
        and the activation is applied immediately, so the f32 intermediates
        never exceed one chunk.
        """
        def chunk_body(c, carry):
            col = pl.ds(pl.multiple_of(c * tc, tc), tc)
            ax = jnp.dot(src_ref[...], adjT_ref[:, col],
                         preferred_element_type=jnp.float32)
            s = (jnp.dot(w0, src_ref[:, col], preferred_element_type=jnp.float32)
                 + jnp.dot(w1, ax.astype(jnp.bfloat16),
                           preferred_element_type=jnp.float32))
            if not is_head:
                dst_ref[:, col] = jnp.maximum(s, 0.0).astype(dst_ref.dtype)
            else:
                # Per-branch 2-class log_softmax: s - logaddexp(s0, s1).
                outs = []
                for b in range(n_branch):
                    sa = s[2 * b:2 * b + 1, :]
                    sb = s[2 * b + 1:2 * b + 2, :]
                    mx = jnp.maximum(sa, sb)
                    lse = mx + jnp.log(jnp.exp(sa - mx) + jnp.exp(sb - mx))
                    outs.append(s[2 * b:2 * b + 2, :] - lse)
                if hp > 2 * n_branch:
                    outs.append(jnp.zeros((hp - 2 * n_branch, tc), jnp.float32))
                res = outs[0] if len(outs) == 1 else jnp.concatenate(outs, axis=0)
                dst_ref[:, col] = res.astype(dst_ref.dtype)
            return carry

        lax.fori_loop(0, n_chunks, chunk_body, 0)

    # Layer 0 reads the (unreplicated) node features directly: no initial copy.
    run_layer(xT_ref, buf_a, wf0_ref[...], wf1_ref[...], False)

    # Remaining hidden layers: two per iteration with static buffer ping-pong.
    n_pairs = n_rest // 2
    if n_pairs:
        def pair_body(i, carry):
            run_layer(buf_a, buf_b, wr0_ref[2 * i], wr1_ref[2 * i], False)
            run_layer(buf_b, buf_a, wr0_ref[2 * i + 1], wr1_ref[2 * i + 1], False)
            return carry
        lax.fori_loop(0, n_pairs, pair_body, 0)
    if n_rest % 2:
        run_layer(buf_a, buf_b, wr0_ref[n_rest - 1], wr1_ref[n_rest - 1], False)
        last = buf_b
    else:
        last = buf_a

    # Fused per-branch log-softmax heads straight into the f32 output.
    run_layer(last, o_ref, wh0_ref[...], wh1_ref[...], True)


def gcn_fused(xT, adjT, wf, wr, wh, n_rest, n_branch):
    """Run the full fused network in ONE pallas_call.

      xT   : (F_in, Npad)         bf16  node features, transposed + lane-padded
      adjT : (Npad, Npad)         bf16  adjacency, transposed + padded
      wf   : ((M, F_in), (M, F_in))     first layer weights, M = B * F_hidden
      wr   : ((L-1, M, M), (L-1, M, M)) remaining hidden-layer block weights
      wh   : ((HP, M), (HP, M))         per-branch head block weights
    """
    wf0, wf1 = wf
    wr0, wr1 = wr
    wh0, wh1 = wh
    _, npad = xT.shape
    m = wf0.shape[0]
    hp = wh0.shape[0]
    tc = _pick_chunk(npad)
    n_chunks = npad // tc

    # VMEM residency estimate (bf16 operands, f32 output + chunk temporaries).
    bf = 2
    need = (adjT.size + xT.size + wf0.size + wf1.size + wr0.size + wr1.size
            + wh0.size + wh1.size) * bf
    need += 2 * m * npad * bf          # bufA / bufB activation scratch
    need += hp * npad * 4              # f32 log-prob output
    need += 2 * m * tc * 4             # f32 per-chunk temporaries (ax, s)
    need += 2 << 20                    # alignment / misc slack

    try:
        capacity = int(pltpu.get_tpu_info().vmem_capacity_bytes)
    except Exception:
        capacity = 64 * 1024 * 1024    # conservative (v7x-sized) fallback
    budget = capacity - (16 << 20)     # headroom for Mosaic internal scratch
    if need > budget:
        # TODO(synk): HBM-streamed fallback for very large graphs — keep the
        # activations/weights resident and stream (Npad, tc) adjacency column
        # blocks over a grid (pipeline_mode=pl.Buffered(2-3), lane axis last).
        raise NotImplementedError(
            f"adjacency too large for the VMEM-resident fused kernel "
            f"(need {need >> 20} MiB, budget {budget >> 20} MiB)")
    vmem_limit = int(min(capacity - (8 << 20), max(32 << 20, need + (16 << 20))))

    kernel = functools.partial(
        _gcn_fused_kernel, n_rest=n_rest, n_chunks=n_chunks, tc=tc,
        n_branch=n_branch, hp=hp)
    full = lambda a: pl.BlockSpec(a.shape, lambda: (0,) * a.ndim)
    out_shape = jax.ShapeDtypeStruct((hp, npad), jnp.float32)

    return pl.pallas_call(
        kernel,
        out_shape=out_shape,
        in_specs=[full(adjT), full(xT), full(wf0), full(wf1),
                  full(wr0), full(wr1), full(wh0), full(wh1)],
        out_specs=pl.BlockSpec(out_shape.shape, lambda: (0, 0)),
        scratch_shapes=[pltpu.VMEM((m, npad), jnp.bfloat16),
                        pltpu.VMEM((m, npad), jnp.bfloat16)],
        compiler_params=pltpu.CompilerParams(vmem_limit_bytes=vmem_limit),
    )(adjT, xT, wf0, wf1, wr0, wr1, wh0, wh1)


# ---------------------------------------------------------------------------
# Weight packing: branch-batched block weights (transposed, bf16).
# ---------------------------------------------------------------------------
def _block_diag(blocks):
    nb = len(blocks)
    if nb == 1:
        return blocks[0]
    rows = []
    for i, blk in enumerate(blocks):
        row = [blk if j == i else
               jnp.zeros((blk.shape[0], blocks[j].shape[1]), blk.dtype)
               for j in range(nb)]
        rows.append(jnp.concatenate(row, axis=1))
    return jnp.concatenate(rows, axis=0)


def _build_fused_weights(conv_params, out_params):
    """Fuse trunk + per-branch weights into branch-batched block matrices.

    Trunk layers are shared across branches (identical diagonal blocks); branch
    hidden layers / heads get per-branch diagonal blocks.  The first layer maps
    the unreplicated input (F_in) to all branches, so its blocks are stacked
    vertically rather than block-diagonally.
    """
    n_branch = len(out_params)
    n_branch_hidden = len(out_params[0]) - 1
    hidden = [("shared", p) for p in conv_params]
    for j in range(n_branch_hidden):
        hidden.append(("branch", [out_params[b][j] for b in range(n_branch)]))
    heads = [out_params[b][-1] for b in range(n_branch)]
    assert hidden, "network needs at least one hidden GraphConv layer"

    def blocks(kind, payload, which):
        if kind == "shared":
            return [payload[which].T] * n_branch
        return [payload[b][which].T for b in range(n_branch)]

    fused = []
    for li, (kind, payload) in enumerate(hidden):
        b0, b1 = blocks(kind, payload, 0), blocks(kind, payload, 1)
        if li == 0:
            w0, w1 = jnp.concatenate(b0, axis=0), jnp.concatenate(b1, axis=0)
        else:
            w0, w1 = _block_diag(b0), _block_diag(b1)
        fused.append((w0.astype(jnp.bfloat16), w1.astype(jnp.bfloat16)))

    m = fused[0][0].shape[0]
    # TODO(synk): heterogeneous hidden widths would need un-stacked per-layer weights.
    assert all(w0.shape == (m, m) for (w0, _) in fused[1:])

    n_rest = len(fused) - 1
    if n_rest:
        wr0 = jnp.stack([w0 for (w0, _) in fused[1:]])
        wr1 = jnp.stack([w1 for (_, w1) in fused[1:]])
    else:  # dummy (never read: n_rest == 0 skips the layer loop)
        wr0 = wr1 = jnp.zeros((1, m, m), jnp.bfloat16)

    hp = _round_up(2 * n_branch, 8)
    h0 = _block_diag([heads[b][0].T for b in range(n_branch)])
    h1 = _block_diag([heads[b][1].T for b in range(n_branch)])
    wh0 = jnp.pad(h0, ((0, hp - 2 * n_branch), (0, 0))).astype(jnp.bfloat16)
    wh1 = jnp.pad(h1, ((0, hp - 2 * n_branch), (0, 0))).astype(jnp.bfloat16)
    return fused[0], (wr0, wr1), (wh0, wh1), n_rest


# ---------------------------------------------------------------------------
# Parameter initialization (mirrors GraphConv.reset_parameters: U(-stdv, stdv)
# with stdv = 1/sqrt(n_out)); deterministic via PRNGKey splitting.
# ---------------------------------------------------------------------------
def init_graph_conv(key, n_in, n_out):
    stdv = 1.0 / math.sqrt(n_out)
    k0_key, k1_key = jax.random.split(key, 2)
    k0 = jax.random.uniform(k0_key, (n_in, n_out), jnp.float32, -stdv, stdv)
    k1 = jax.random.uniform(k1_key, (n_in, n_out), jnp.float32, -stdv, stdv)
    # TODO(synk): bias parameter exists in __init__ but is never used in forward().
    return (k0, k1)


def init_gcn(key, n_in=HIDW, n_out=1):
    latent = [n_in] + [HIDW] * (HIDD - HIDB)            # 9 trunk convs 32 -> 32
    branch_latent = [HIDW] * HIDB
    keys = iter(jax.random.split(key, 64))

    conv_params = [init_graph_conv(next(keys), i, o)
                   for i, o in zip(latent[:-1], latent[1:])]

    bl = latent[-1:] + branch_latent                    # [32, 32]
    out_params = []
    for _ in range(n_out):
        branch = [init_graph_conv(next(keys), i, o)
                  for i, o in zip(bl[:-1], bl[1:])]
        branch.append(init_graph_conv(next(keys), bl[-1], 2))
        out_params.append(branch)
    return conv_params, out_params


# ---------------------------------------------------------------------------
# GCN forward: one fused pallas_call for the whole network (all branches are
# batched along the MXU sublane axis).  Returns a list of (N, 2) log-prob
# matrices, one per output branch.
# ---------------------------------------------------------------------------
def gcn_forward(x, adj, params):
    conv_params, out_params = params
    n, _ = x.shape
    n_branch = len(out_params)
    npad = _round_up(max(n, 1), LANE)

    # Lane-dense transposed, padded, bf16 operands (wrapper-side layout plumbing).
    xT = jnp.pad(x.T, ((0, 0), (0, npad - n))).astype(jnp.bfloat16)
    adjT = jnp.pad(adj.T, ((0, npad - n), (0, npad - n))).astype(jnp.bfloat16)

    wf, wr, wh, n_rest = _build_fused_weights(conv_params, out_params)
    out = gcn_fused(xT, adjT, wf, wr, wh, n_rest, n_branch)   # (HP, Npad) f32

    return [out[2 * b:2 * b + 2, :n].T for b in range(n_branch)]


if __name__ == "__main__":
    import numpy as np

    key = jax.random.PRNGKey(0)
    k_x, k_adj, k_p1, k_p2 = jax.random.split(key, 4)

    N = 8                     # number of graph nodes (small example)
    F_IN = HIDW               # 32 input features, as implied by the module

    x = jax.random.normal(k_x, (N, F_IN), dtype=jnp.float32)
    adj = jax.random.uniform(k_adj, (N, N), dtype=jnp.float32)

    # Single output branch: trunk + branch + log-softmax head in one pallas_call.
    params1 = init_gcn(k_p1, n_in=F_IN, n_out=1)
    out1 = jax.jit(functools.partial(gcn_forward, params=params1))(x, adj)
    jax.block_until_ready(out1)
    assert len(out1) == 1 and out1[0].shape == (N, 2)

    # Two output branches: both branches share the adjacency GEMM inside the
    # same fused call (batched along the MXU sublane axis).
    params2 = init_gcn(k_p2, n_in=F_IN, n_out=2)
    out2 = jax.jit(functools.partial(gcn_forward, params=params2))(x, adj)
    jax.block_until_ready(out2)
    assert len(out2) == 2 and all(o.shape == (N, 2) for o in out2)

    # Sanity: rows of log-probabilities must logsumexp to ~0 (exact by head
    # construction, independent of bf16 layer drift).
    for lp in list(out1) + list(out2):
        lp = np.asarray(lp, dtype=np.float64)
        lse = np.log(np.exp(lp).sum(axis=1))
        np.testing.assert_allclose(lse, 0.0, atol=1e-3)

    print("KERNEL_OK")
</pallas_src>

<mosaic_0001>
module attributes {stable_mosaic.version = 11 : i64} {
  func.func @_gcn_fused_kernel(%arg0: memref<128x128xbf16, #tpu.memory_space<vmem>>, %arg1: memref<32x128xbf16, #tpu.memory_space<vmem>>, %arg2: memref<32x32xbf16, #tpu.memory_space<vmem>>, %arg3: memref<32x32xbf16, #tpu.memory_space<vmem>>, %arg4: memref<9x32x32xbf16, #tpu.memory_space<vmem>>, %arg5: memref<9x32x32xbf16, #tpu.memory_space<vmem>>, %arg6: memref<8x32xbf16, #tpu.memory_space<vmem>>, %arg7: memref<8x32xbf16, #tpu.memory_space<vmem>>, %arg8: memref<8x128xf32, #tpu.memory_space<vmem>>, %arg9: memref<32x128xbf16, #tpu.memory_space<vmem>>, %arg10: memref<32x128xbf16, #tpu.memory_space<vmem>>) attributes {dimension_semantics = [], scalar_prefetch = 0 : i64, scratch_operands = 2 : i64, tpu.core_type = #tpu.core_type<tc>} {
    %c0 = arith.constant 0 : index
    %c0_0 = arith.constant 0 : index
    %0 = vector.load %arg2[%c0, %c0_0] : memref<32x32xbf16, #tpu.memory_space<vmem>>, vector<32x32xbf16>
    %c0_1 = arith.constant 0 : index
    %c0_2 = arith.constant 0 : index
    %1 = vector.load %arg3[%c0_1, %c0_2] : memref<32x32xbf16, #tpu.memory_space<vmem>>, vector<32x32xbf16>
    %c0_i32 = arith.constant 0 : i32
    %c128_i32 = arith.constant 128 : i32
    %2 = arith.muli %c0_i32, %c128_i32 : i32
    %3 = tpu.assume_multiple %2, 128 : i32
    %c0_3 = arith.constant 0 : index
    %c0_4 = arith.constant 0 : index
    %4 = vector.load %arg1[%c0_3, %c0_4] : memref<32x128xbf16, #tpu.memory_space<vmem>>, vector<32x128xbf16>
    %c0_5 = arith.constant 0 : index
    %5 = arith.index_cast %3 : i32 to index
    %6 = vector.load %arg0[%c0_5, %5] : memref<128x128xbf16, #tpu.memory_space<vmem>>, vector<128x128xbf16>
    %cst = arith.constant dense<0.000000e+00> : vector<32x128xf32>
    %7 = tpu.matmul %4, %6, %cst {dimension_numbers = #tpu.dot_dimension_numbers<[1], [0], [0], [1], [0, 0, 1, 1], [], []>} : vector<32x128xbf16>, vector<128x128xbf16>, vector<32x128xf32> -> vector<32x128xf32>
    %c0_6 = arith.constant 0 : index
    %8 = arith.index_cast %3 : i32 to index
    %9 = vector.load %arg1[%c0_6, %8] : memref<32x128xbf16, #tpu.memory_space<vmem>>, vector<32x128xbf16>
    %cst_7 = arith.constant dense<0.000000e+00> : vector<32x128xf32>
    %10 = tpu.matmul %0, %9, %cst_7 {dimension_numbers = #tpu.dot_dimension_numbers<[1], [0], [0], [1], [0, 0, 1, 1], [], []>} : vector<32x32xbf16>, vector<32x128xbf16>, vector<32x128xf32> -> vector<32x128xf32>
    %11 = arith.truncf %7 : vector<32x128xf32> to vector<32x128xbf16>
    %cst_8 = arith.constant dense<0.000000e+00> : vector<32x128xf32>
    %12 = tpu.matmul %1, %11, %cst_8 {dimension_numbers = #tpu.dot_dimension_numbers<[1], [0], [0], [1], [0, 0, 1, 1], [], []>} : vector<32x32xbf16>, vector<32x128xbf16>, vector<32x128xf32> -> vector<32x128xf32>
    %13 = arith.addf %10, %12 : vector<32x128xf32>
    %cst_9 = arith.constant 0.000000e+00 : f32
    %14 = vector.broadcast %cst_9 : f32 to vector<32x128xf32>
    %15 = arith.maximumf %13, %14 : vector<32x128xf32>
    %16 = arith.truncf %15 : vector<32x128xf32> to vector<32x128xbf16>
    %c0_10 = arith.constant 0 : index
    %17 = arith.index_cast %3 : i32 to index
    %18 = vector.load %arg9[%c0_10, %17] : memref<32x128xbf16, #tpu.memory_space<vmem>>, vector<32x128xbf16>
    tpu.vector_store %arg9[%c0_10, %17], %16 {strides = array<i32>} : memref<32x128xbf16, #tpu.memory_space<vmem>>, vector<32x128xbf16>,
    %c1_i32 = arith.constant 1 : i32
    %c0_i32_11 = arith.constant 0 : i32
    %c4_i32 = arith.constant 4 : i32
    %19 = arith.addi %c0_i32_11, %c4_i32 : i32
    %c1_i32_12 = arith.constant 1 : i32
    scf.for %arg11 = %c0_i32_11 to %19 step %c1_i32_12  : i32 {
      %c2_i32 = arith.constant 2 : i32
      %72 = arith.muli %c2_i32, %arg11 : i32
      %73 = arith.index_cast %72 : i32 to index
      %c0_47 = arith.constant 0 : index
      %c0_48 = arith.constant 0 : index
      %74 = vector.load %arg4[%73, %c0_47, %c0_48] : memref<9x32x32xbf16, #tpu.memory_space<vmem>>, vector<1x32x32xbf16>
      %75 = vector.shape_cast %74 : vector<1x32x32xbf16> to vector<32x32xbf16>
      %c2_i32_49 = arith.constant 2 : i32
      %76 = arith.muli %c2_i32_49, %arg11 : i32
      %77 = arith.index_cast %76 : i32 to index
      %c0_50 = arith.constant 0 : index
      %c0_51 = arith.constant 0 : index
      %78 = vector.load %arg5[%77, %c0_50, %c0_51] : memref<9x32x32xbf16, #tpu.memory_space<vmem>>, vector<1x32x32xbf16>
      %79 = vector.shape_cast %78 : vector<1x32x32xbf16> to vector<32x32xbf16>
      %c0_i32_52 = arith.constant 0 : i32
      %c128_i32_53 = arith.constant 128 : i32
      %80 = arith.muli %c0_i32_52, %c128_i32_53 : i32
      %81 = tpu.assume_multiple %80, 128 : i32
      %c0_54 = arith.constant 0 : index
      %c0_55 = arith.constant 0 : index
      %82 = vector.load %arg9[%c0_54, %c0_55] : memref<32x128xbf16, #tpu.memory_space<vmem>>, vector<32x128xbf16>
      %c0_56 = arith.constant 0 : index
      %83 = arith.index_cast %81 : i32 to index
      %84 = vector.load %arg0[%c0_56, %83] : memref<128x128xbf16, #tpu.memory_space<vmem>>, vector<128x128xbf16>
      %cst_57 = arith.constant dense<0.000000e+00> : vector<32x128xf32>
      %85 = tpu.matmul %82, %84, %cst_57 {dimension_numbers = #tpu.dot_dimension_numbers<[1], [0], [0], [1], [0, 0, 1, 1], [], []>} : vector<32x128xbf16>, vector<128x128xbf16>, vector<32x128xf32> -> vector<32x128xf32>
      %c0_58 = arith.constant 0 : index
      %86 = arith.index_cast %81 : i32 to index
      %87 = vector.load %arg9[%c0_58, %86] : memref<32x128xbf16, #tpu.memory_space<vmem>>, vector<32x128xbf16>
      %cst_59 = arith.constant dense<0.000000e+00> : vector<32x128xf32>
      %88 = tpu.matmul %75, %87, %cst_59 {dimension_numbers = #tpu.dot_dimension_numbers<[1], [0], [0], [1], [0, 0, 1, 1], [], []>} : vector<32x32xbf16>, vector<32x128xbf16>, vector<32x128xf32> -> vector<32x128xf32>
      %89 = arith.truncf %85 : vector<32x128xf32> to vector<32x128xbf16>
      %cst_60 = arith.constant dense<0.000000e+00> : vector<32x128xf32>
      %90 = tpu.matmul %79, %89, %cst_60 {dimension_numbers = #tpu.dot_dimension_numbers<[1], [0], [0], [1], [0, 0, 1, 1], [], []>} : vector<32x32xbf16>, vector<32x128xbf16>, vector<32x128xf32> -> vector<32x128xf32>
      %91 = arith.addf %88, %90 : vector<32x128xf32>
      %cst_61 = arith.constant 0.000000e+00 : f32
      %92 = vector.broadcast %cst_61 : f32 to vector<32x128xf32>
      %93 = arith.maximumf %91, %92 : vector<32x128xf32>
      %94 = arith.truncf %93 : vector<32x128xf32> to vector<32x128xbf16>
      %c0_62 = arith.constant 0 : index
      %95 = arith.index_cast %81 : i32 to index
      %96 = vector.load %arg10[%c0_62, %95] : memref<32x128xbf16, #tpu.memory_space<vmem>>, vector<32x128xbf16>
      tpu.vector_store %arg10[%c0_62, %95], %94 {strides = array<i32>} : memref<32x128xbf16, #tpu.memory_space<vmem>>, vector<32x128xbf16>,
      %c1_i32_63 = arith.constant 1 : i32
      %c2_i32_64 = arith.constant 2 : i32
      %97 = arith.muli %c2_i32_64, %arg11 : i32
      %c1_i32_65 = arith.constant 1 : i32
      %98 = arith.addi %97, %c1_i32_65 : i32
      %99 = arith.index_cast %98 : i32 to index
      %c0_66 = arith.constant 0 : index
      %c0_67 = arith.constant 0 : index
      %100 = vector.load %arg4[%99, %c0_66, %c0_67] : memref<9x32x32xbf16, #tpu.memory_space<vmem>>, vector<1x32x32xbf16>
      %101 = vector.shape_cast %100 : vector<1x32x32xbf16> to vector<32x32xbf16>
      %c2_i32_68 = arith.constant 2 : i32
      %102 = arith.muli %c2_i32_68, %arg11 : i32
      %c1_i32_69 = arith.constant 1 : i32
      %103 = arith.addi %102, %c1_i32_69 : i32
      %104 = arith.index_cast %103 : i32 to index
      %c0_70 = arith.constant 0 : index
      %c0_71 = arith.constant 0 : index
      %105 = vector.load %arg5[%104, %c0_70, %c0_71] : memref<9x32x32xbf16, #tpu.memory_space<vmem>>, vector<1x32x32xbf16>
      %106 = vector.shape_cast %105 : vector<1x32x32xbf16> to vector<32x32xbf16>
      %c0_i32_72 = arith.constant 0 : i32
      %c128_i32_73 = arith.constant 128 : i32
      %107 = arith.muli %c0_i32_72, %c128_i32_73 : i32
      %108 = tpu.assume_multiple %107, 128 : i32
      %c0_74 = arith.constant 0 : index
      %c0_75 = arith.constant 0 : index
      %109 = vector.load %arg10[%c0_74, %c0_75] : memref<32x128xbf16, #tpu.memory_space<vmem>>, vector<32x128xbf16>
      %c0_76 = arith.constant 0 : index
      %110 = arith.index_cast %108 : i32 to index
      %111 = vector.load %arg0[%c0_76, %110] : memref<128x128xbf16, #tpu.memory_space<vmem>>, vector<128x128xbf16>
      %cst_77 = arith.constant dense<0.000000e+00> : vector<32x128xf32>
      %112 = tpu.matmul %109, %111, %cst_77 {dimension_numbers = #tpu.dot_dimension_numbers<[1], [0], [0], [1], [0, 0, 1, 1], [], []>} : vector<32x128xbf16>, vector<128x128xbf16>, vector<32x128xf32> -> vector<32x128xf32>
      %c0_78 = arith.constant 0 : index
      %113 = arith.index_cast %108 : i32 to index
      %114 = vector.load %arg10[%c0_78, %113] : memref<32x128xbf16, #tpu.memory_space<vmem>>, vector<32x128xbf16>
      %cst_79 = arith.constant dense<0.000000e+00> : vector<32x128xf32>
      %115 = tpu.matmul %101, %114, %cst_79 {dimension_numbers = #tpu.dot_dimension_numbers<[1], [0], [0], [1], [0, 0, 1, 1], [], []>} : vector<32x32xbf16>, vector<32x128xbf16>, vector<32x128xf32> -> vector<32x128xf32>
      %116 = arith.truncf %112 : vector<32x128xf32> to vector<32x128xbf16>
      %cst_80 = arith.constant dense<0.000000e+00> : vector<32x128xf32>
      %117 = tpu.matmul %106, %116, %cst_80 {dimension_numbers = #tpu.dot_dimension_numbers<[1], [0], [0], [1], [0, 0, 1, 1], [], []>} : vector<32x32xbf16>, vector<32x128xbf16>, vector<32x128xf32> -> vector<32x128xf32>
      %118 = arith.addf %115, %117 : vector<32x128xf32>
      %cst_81 = arith.constant 0.000000e+00 : f32
      %119 = vector.broadcast %cst_81 : f32 to vector<32x128xf32>
      %120 = arith.maximumf %118, %119 : vector<32x128xf32>
      %121 = arith.truncf %120 : vector<32x128xf32> to vector<32x128xbf16>
      %c0_82 = arith.constant 0 : index
      %122 = arith.index_cast %108 : i32 to index
      %123 = vector.load %arg9[%c0_82, %122] : memref<32x128xbf16, #tpu.memory_space<vmem>>, vector<32x128xbf16>
      tpu.vector_store %arg9[%c0_82, %122], %121 {strides = array<i32>} : memref<32x128xbf16, #tpu.memory_space<vmem>>, vector<32x128xbf16>,
      %c1_i32_83 = arith.constant 1 : i32
    }
    %c4_i32_13 = arith.constant 4 : i32
    %c8 = arith.constant 8 : index
    %c0_14 = arith.constant 0 : index
    %c0_15 = arith.constant 0 : index
    %20 = vector.load %arg4[%c8, %c0_14, %c0_15] : memref<9x32x32xbf16, #tpu.memory_space<vmem>>, vector<1x32x32xbf16>
    %21 = vector.shape_cast %20 : vector<1x32x32xbf16> to vector<32x32xbf16>
    %c8_16 = arith.constant 8 : index
    %c0_17 = arith.constant 0 : index
    %c0_18 = arith.constant 0 : index
    %22 = vector.load %arg5[%c8_16, %c0_17, %c0_18] : memref<9x32x32xbf16, #tpu.memory_space<vmem>>, vector<1x32x32xbf16>
    %23 = vector.shape_cast %22 : vector<1x32x32xbf16> to vector<32x32xbf16>
    %c0_i32_19 = arith.constant 0 : i32
    %c128_i32_20 = arith.constant 128 : i32
    %24 = arith.muli %c0_i32_19, %c128_i32_20 : i32
    %25 = tpu.assume_multiple %24, 128 : i32
    %c0_21 = arith.constant 0 : index
    %c0_22 = arith.constant 0 : index
    %26 = vector.load %arg9[%c0_21, %c0_22] : memref<32x128xbf16, #tpu.memory_space<vmem>>, vector<32x128xbf16>
    %c0_23 = arith.constant 0 : index
    %27 = arith.index_cast %25 : i32 to index
    %28 = vector.load %arg0[%c0_23, %27] : memref<128x128xbf16, #tpu.memory_space<vmem>>, vector<128x128xbf16>
    %cst_24 = arith.constant dense<0.000000e+00> : vector<32x128xf32>
    %29 = tpu.matmul %26, %28, %cst_24 {dimension_numbers = #tpu.dot_dimension_numbers<[1], [0], [0], [1], [0, 0, 1, 1], [], []>} : vector<32x128xbf16>, vector<128x128xbf16>, vector<32x128xf32> -> vector<32x128xf32>
    %c0_25 = arith.constant 0 : index
    %30 = arith.index_cast %25 : i32 to index
    %31 = vector.load %arg9[%c0_25, %30] : memref<32x128xbf16, #tpu.memory_space<vmem>>, vector<32x128xbf16>
    %cst_26 = arith.constant dense<0.000000e+00> : vector<32x128xf32>
    %32 = tpu.matmul %21, %31, %cst_26 {dimension_numbers = #tpu.dot_dimension_numbers<[1], [0], [0], [1], [0, 0, 1, 1], [], []>} : vector<32x32xbf16>, vector<32x128xbf16>, vector<32x128xf32> -> vector<32x128xf32>
    %33 = arith.truncf %29 : vector<32x128xf32> to vector<32x128xbf16>
    %cst_27 = arith.constant dense<0.000000e+00> : vector<32x128xf32>
    %34 = tpu.matmul %23, %33, %cst_27 {dimension_numbers = #tpu.dot_dimension_numbers<[1], [0], [0], [1], [0, 0, 1, 1], [], []>} : vector<32x32xbf16>, vector<32x128xbf16>, vector<32x128xf32> -> vector<32x128xf32>
    %35 = arith.addf %32, %34 : vector<32x128xf32>
    %cst_28 = arith.constant 0.000000e+00 : f32
    %36 = vector.broadcast %cst_28 : f32 to vector<32x128xf32>
    %37 = arith.maximumf %35, %36 : vector<32x128xf32>
    %38 = arith.truncf %37 : vector<32x128xf32> to vector<32x128xbf16>
    %c0_29 = arith.constant 0 : index
    %39 = arith.index_cast %25 : i32 to index
    %40 = vector.load %arg10[%c0_29, %39] : memref<32x128xbf16, #tpu.memory_space<vmem>>, vector<32x128xbf16>
    tpu.vector_store %arg10[%c0_29, %39], %38 {strides = array<i32>} : memref<32x128xbf16, #tpu.memory_space<vmem>>, vector<32x128xbf16>,
    %c1_i32_30 = arith.constant 1 : i32
    %c0_31 = arith.constant 0 : index
    %c0_32 = arith.constant 0 : index
    %41 = vector.load %arg6[%c0_31, %c0_32] : memref<8x32xbf16, #tpu.memory_space<vmem>>, vector<8x32xbf16>
    %c0_33 = arith.constant 0 : index
    %c0_34 = arith.constant 0 : index
    %42 = vector.load %arg7[%c0_33, %c0_34] : memref<8x32xbf16, #tpu.memory_space<vmem>>, vector<8x32xbf16>
    %c0_i32_35 = arith.constant 0 : i32
    %c128_i32_36 = arith.constant 128 : i32
    %43 = arith.muli %c0_i32_35, %c128_i32_36 : i32
    %44 = tpu.assume_multiple %43, 128 : i32
    %c0_37 = arith.constant 0 : index
    %c0_38 = arith.constant 0 : index
    %45 = vector.load %arg10[%c0_37, %c0_38] : memref<32x128xbf16, #tpu.memory_space<vmem>>, vector<32x128xbf16>
    %c0_39 = arith.constant 0 : index
    %46 = arith.index_cast %44 : i32 to index
    %47 = vector.load %arg0[%c0_39, %46] : memref<128x128xbf16, #tpu.memory_space<vmem>>, vector<128x128xbf16>
    %cst_40 = arith.constant dense<0.000000e+00> : vector<32x128xf32>
    %48 = tpu.matmul %45, %47, %cst_40 {dimension_numbers = #tpu.dot_dimension_numbers<[1], [0], [0], [1], [0, 0, 1, 1], [], []>} : vector<32x128xbf16>, vector<128x128xbf16>, vector<32x128xf32> -> vector<32x128xf32>
    %c0_41 = arith.constant 0 : index
    %49 = arith.index_cast %44 : i32 to index
    %50 = vector.load %arg10[%c0_41, %49] : memref<32x128xbf16, #tpu.memory_space<vmem>>, vector<32x128xbf16>
    %cst_42 = arith.constant dense<0.000000e+00> : vector<8x128xf32>
    %51 = tpu.matmul %41, %50, %cst_42 {dimension_numbers = #tpu.dot_dimension_numbers<[1], [0], [0], [1], [0, 0, 1, 1], [], []>} : vector<8x32xbf16>, vector<32x128xbf16>, vector<8x128xf32> -> vector<8x128xf32>
    %52 = arith.truncf %48 : vector<32x128xf32> to vector<32x128xbf16>
    %cst_43 = arith.constant dense<0.000000e+00> : vector<8x128xf32>
    %53 = tpu.matmul %42, %52, %cst_43 {dimension_numbers = #tpu.dot_dimension_numbers<[1], [0], [0], [1], [0, 0, 1, 1], [], []>} : vector<8x32xbf16>, vector<32x128xbf16>, vector<8x128xf32> -> vector<8x128xf32>
    %54 = arith.addf %51, %53 : vector<8x128xf32>
    %55 = vector.extract_strided_slice %54 {offsets = [0, 0], sizes = [1, 128], strides = [1, 1]} : vector<8x128xf32> to vector<1x128xf32>
    %56 = vector.extract_strided_slice %54 {offsets = [1, 0], sizes = [1, 128], strides = [1, 1]} : vector<8x128xf32> to vector<1x128xf32>
    %57 = arith.maximumf %55, %56 : vector<1x128xf32>
    %58 = arith.subf %55, %57 : vector<1x128xf32>
    %59 = math.exp %58 : vector<1x128xf32>
    %60 = arith.subf %56, %57 : vector<1x128xf32>
    %61 = math.exp %60 : vector<1x128xf32>
    %62 = arith.addf %59, %61 : vector<1x128xf32>
    %63 = math.log %62 : vector<1x128xf32>
    %64 = arith.addf %57, %63 : vector<1x128xf32>
    %65 = vector.extract_strided_slice %54 {offsets = [0, 0], sizes = [2, 128], strides = [1, 1]} : vector<8x128xf32> to vector<2x128xf32>
    %66 = vector.broadcast %64 : vector<1x128xf32> to vector<2x128xf32>
    %67 = arith.subf %65, %66 : vector<2x128xf32>
    %cst_44 = arith.constant 0.000000e+00 : f32
    %68 = vector.broadcast %cst_44 : f32 to vector<6x128xf32>
    %69 = tpu.concatenate %67, %68 in 0 : vector<2x128xf32>, vector<6x128xf32> -> vector<8x128xf32>
    %c0_45 = arith.constant 0 : index
    %70 = arith.index_cast %44 : i32 to index
    %71 = vector.load %arg8[%c0_45, %70] : memref<8x128xf32, #tpu.memory_space<vmem>>, vector<8x128xf32>
    tpu.vector_store %arg8[%c0_45, %70], %69 {strides = array<i32>} : memref<8x128xf32, #tpu.memory_space<vmem>>, vector<8x128xf32>,
    %c1_i32_46 = arith.constant 1 : i32
    return
  }
}

</mosaic_0001>

<bundles_post_ra>
// kernel: gcn_forward.1
= control target key start
LH: loop header
LB: loop body
LE: loop exit
PB: predicated region body
PF: predicated region fallthrough
CT: control target
= control target key end

     0   :  { %13 = vsyncpa [#allocation5], 0  ;;  %s1906_s0 = inlined_call_operand.vmem [shape: bf16[128,128], index: 0, kind: input, shape index: {}]   ;;  %s1907_s1 = inlined_call_operand.vmem [shape: bf16[32,128], index: 1, kind: input, shape index: {}]   ;;  %s1908_s2 = inlined_call_operand.vmem [shape: bf16[32,32], index: 2, kind: input, shape index: {}]   ;;  %s1909_s3 = inlined_call_operand.vmem [shape: bf16[32,32], index: 3, kind: input, shape index: {}]   ;;  %s1910_s4 = inlined_call_operand.hbm [shape: bf16[9,32,32], index: 4, kind: input, shape index: {}]   ;;  %s1911_s5 = inlined_call_operand.hbm [shape: bf16[9,32,32], index: 5, kind: input, shape index: {}]   ;;  %s1912_s6 = inlined_call_operand.vmem [shape: bf16[8,32], index: 6, kind: input, shape index: {}]   ;;  %s1913_s7 = inlined_call_operand.vmem [shape: bf16[8,32], index: 7, kind: input, shape index: {}]   ;;  %s1914_s8 = inlined_call_operand.vmem [shape: f32[8,128], index: 8, kind: output, shape index: {}]  }
   0x1   :  { %s27_s29 = sshll.u32 %s1910_s4, 4  ;;  %s28_s29 = int_to_ptr.hbm [resolvable:$true] %s27_s29 }
   0x2   :  { %14 = vsyncpa [#allocation7], 0  ;;  %s1659_s30 = smov [#allocation4]   ;;  %s40_s12 = sshll.u32 %s1911_s5, 4  ;;  %s41_s12 = int_to_ptr.hbm [resolvable:$true] %s40_s12 }
   0x3   :  { %s29_s9 = sshll.u32 %s1659_s30, 4  ;;  %s1660_s13 = smov 64   ;;  %s30_s9 = int_to_ptr.vmem [resolvable:$true] %s29_s9 }
   0x4   :  { %s1661_s14 = smov 4   ;;  %s1662_s15 = smov [#allocation6]  }
   0x5   :  { %35 = dma.hbm_to_vmem [thread:$0]  %s28_s29, 2304, %s30_s9, [#allocation5], %s1660_s13, %s1660_s13, %s1661_s14  }
   0x6   :  { %s42_s16 = sshll.u32 %s1662_s15, 4  ;;  %s43_s16 = int_to_ptr.vmem [resolvable:$true] %s42_s16 }
   0x7   :  { %48 = dma.hbm_to_vmem [thread:$0]  %s41_s12, 2304, %s43_s16, [#allocation7], %s1660_s13, %s1660_s13, %s1661_s14  }
   0x8   :  { %1651 = dma.done.wait [#allocation5], 2304  }
   0x9   :  { %1652 = vsyncadd [#allocation5], 4294964992 }
   0xa   :  { %1653 = dma.done.wait [#allocation7], 2304  }
   0xb   :  { %1654 = vsyncadd [#allocation7], 4294964992  ;;  %v1461_v0 = vld [vmem:[%s1906_s0 + $0x38] sm:$0xff]  ;;  %v1460_v1 = vld [vmem:[%s1906_s0 + $0x30] sm:$0xff]  ;;  %vm185_vm0 = vcmask 261120  }
   0xc   :  { %1573 = vmatpush.bf16.msra.mxu3 %v1461_v0  ;;  %150 = vmatpush.bf16.msra.mxu0 %v1461_v0  ;;  %v1459_v2 = vld [vmem:[%s1906_s0 + $0x28] sm:$0xff]  ;;  %v1458_v3 = vld [vmem:[%s1906_s0 + $0x20] sm:$0xff]  ;;  %v1457_v4 = vld [vmem:[%s1906_s0 + $0x18] sm:$0xff] }
   0xd   :  { %v1456_v5 = vld [vmem:[%s1906_s0 + $0x10] sm:$0xff]  ;;  %v1455_v6 = vld [vmem:[%s1906_s0 + $0x8] sm:$0xff]  ;;  %v1454_v7 = vld [vmem:[%s1906_s0] sm:$0xff] }
   0xe   :  { %v1453_v8 = vld [vmem:[%s1907_s1 + $0x8] sm:$0xff]  ;;  %v1452_v9 = vld [vmem:[%s1907_s1] sm:$0xff] }
   0xf   :  { %v1463_v10 = vld [vmem:[%s1907_s1 + $0x8] sm:$0xff]  ;;  %v1462_v11 = vld [vmem:[%s1907_s1] sm:$0xff] }
  0x10   :  { %1574 = vmatpush.bf16.msra.mxu3 %v1460_v1  ;;  %151 = vmatpush.bf16.msra.mxu0 %v1460_v1  ;;  %v1448_v12 = vld [vmem:[%s1908_s2] sm:$0xff]  ;;  %v1449_v13 = vld [vmem:[%s1908_s2 + $0x8] sm:$0xff]  ;;  %s1766_s2 = smov 0  }
  0x11   :  { %245 = vmatpush.bf16.msra.mxu2 %v1463_v10  ;;  %v1450_v20 = vld [vmem:[%s1909_s3] sm:$0xff]  ;;  %v1451_v21 = vld [vmem:[%s1909_s3 + $0x8] sm:$0xff] }
  0x14   :  { %1575 = vmatpush.bf16.msra.mxu3 %v1459_v2  ;;  %152 = vmatpush.bf16.msra.mxu0 %v1459_v2 }
  0x15   :  { %246 = vmatpush.bf16.msra.mxu2 %v1462_v11 }
  0x18   :  { %1576 = vmatpush.bf16.msra.mxu3 %v1458_v3  ;;  %153 = vmatpush.bf16.msra.mxu0 %v1458_v3 }
  0x19   :  { %1176 = vmatmul.msk.bf16.vlgmr.msra.gmra.mxu2 %vm185_vm0, %v1448_v12 }
  0x1c   :  { %1577 = vmatpush.bf16.msra.mxu3 %v1457_v4  ;;  %154 = vmatpush.bf16.msra.mxu0 %v1457_v4 }
  0x20   :  { %1578 = vmatpush.bf16.msra.mxu3 %v1456_v5  ;;  %155 = vmatpush.bf16.msra.mxu0 %v1456_v5 }
  0x24   :  { %1579 = vmatpush.bf16.msra.mxu3 %v1455_v6  ;;  %156 = vmatpush.bf16.msra.mxu0 %v1455_v6 }
  0x28   :  { %1580 = vmatpush.bf16.msra.mxu3 %v1454_v7  ;;  %157 = vmatpush.bf16.msra.mxu0 %v1454_v7 }
  0x29   :  { %1177 = vmatmul.msk.bf16.gmra.mxu2 %vm185_vm0, %v1449_v13 }
  0x2b   :  { %163 = vmatmul.bf16.vlgmr.msra.gmra.mxu3 %v1453_v8  ;;  %158 = vmatmul.bf16.vlgmr.msra.gmra.mxu0 %v1452_v9 }
  0x9c   :  { %v248_v22 = vpop.f32.mrf.mxu2 }
  0xa4   :  { %v250_v24 = vpop.f32.mrf.mxu2 }
  0xa8   :  { %v159_v14 = vpop.f32.mrf.mxu0 }
  0xac   :  { %v253_v31 = vpop.f32.mrf.mxu2 }
  0xae   :  { %v164_v15 = vpop.f32.mrf.mxu3 }
  0xb0   :  { %v161_v18 = vpop.f32.mrf.mxu0 }
  0xb1   :  { %v173_v19 = vpack.c.bf16 %v161_v18, %v159_v14 }
  0xb4   :  { %v255_v34 = vpop.f32.mrf.mxu2 }
  0xb6   :  { %v166_v16 = vpop.f32.mrf.mxu3 }
  0xb7   :  { %v174_v17 = vpack.c.bf16 %v166_v16, %v164_v15 }
  0xb9   :  { %198 = vmatpush.bf16.msra.mxu1 %v174_v17 }
  0xbd   :  { %199 = vmatpush.bf16.msra.mxu1 %v173_v19 }
  0xc0   :  { %1158 = vmatmul.msk.bf16.vlgmr.msra.gmra.mxu1 %vm185_vm0, %v1450_v20 }
  0xd0   :  { %1159 = vmatmul.msk.bf16.gmra.mxu1 %vm185_vm0, %v1451_v21 }
 0x13d   :  { %v201_v23 = vpop.f32.mrf.mxu1 }
 0x13e   :  { %v249_v25 = vadd.f32 %v248_v22, %v201_v23 }
 0x140   :  { %v258_v28 = vmax.f32 %v249_v25, 0.0 }
 0x145   :  { %v203_v26 = vpop.f32.mrf.mxu1 }
 0x146   :  { %v251_v27 = vadd.f32 %v250_v24, %v203_v26 }
 0x148   :  { %v259_v29 = vmax.f32 %v251_v27, 0.0 }
 0x14a   :  { %v1532_v30 = vpack.c.bf16 %v259_v29, %v258_v28 }
 0x14c   :  { %1533 = vst [vmem:[#allocation2] sm:$0xff] %v1532_v30  }
 0x14d   :  { %v206_v32 = vpop.f32.mrf.mxu1 }
 0x14e   :  { %v254_v33 = vadd.f32 %v253_v31, %v206_v32 }
 0x150   :  { %v260_v37 = vmax.f32 %v254_v33, 0.0 }
 0x155   :  { %v208_v35 = vpop.f32.mrf.mxu1 }
 0x156   :  { %v256_v36 = vadd.f32 %v255_v34, %v208_v35 }
 0x158   :  { %v261_v38 = vmax.f32 %v256_v36, 0.0 }
 0x15a   :  { %v1537_v39 = vpack.c.bf16 %v261_v38, %v260_v37 }
 0x15c   :  { %1569 = vst [vmem:[#allocation2 + $0x8] sm:$0xff] %v1537_v39  }
 0x15d LB: > { %v1480_v40 = vld [vmem:[%s1906_s0 + $0x38] sm:$0xff]  ;;  %v1479_v41 = vld [vmem:[%s1906_s0 + $0x30] sm:$0xff]  ;;  %v1478_v42 = vld [vmem:[%s1906_s0 + $0x28] sm:$0xff]  ;;  %s1465_s15 = sshll.u32 %s1657_s2, 5  ;;  %s275_s2 = sadd.s32 1, %s1657_s2   ;;  %s1657_s2 = sphi %s1766_s2, %s275_s2  }
 0x15e   : > { %370 = vmatpush.bf16.msra.mxu0 %v1480_v40  ;;  %v1477_v43 = vld [vmem:[%s1906_s0 + $0x20] sm:$0xff]  ;;  %v1476_v44 = vld [vmem:[%s1906_s0 + $0x18] sm:$0xff]  ;;  %v1475_v45 = vld [vmem:[%s1906_s0 + $0x10] sm:$0xff]  ;;  %s1796_s16 = scalar_lea.vmem [#allocation4], %s1465_s15  ;;  %s1802_s4 = scalar_lea.vmem [#allocation6], %s1465_s15 }
 0x15f   : > { %v1474_v46 = vld [vmem:[%s1906_s0 + $0x8] sm:$0xff]  ;;  %v1473_v47 = vld [vmem:[%s1906_s0] sm:$0xff]  ;;  %v1498_v62 = vld [vmem:[%s1906_s0 + $0x38] sm:$0xff]  ;;  %p272_p0 = scmp.ge.s32.totalorder %s275_s2, 4  }
 0x160   : > { %v1471_v48 = vld [vmem:[#allocation2] sm:$0xff]  ;;  %v1467_v54 = vld [vmem:[%s1796_s16 + $0x8] sm:$0xff]  ;;  %583 = vmatpush.bf16.msra.mxu3 %v1498_v62  ;;  %v1497_v63 = vld [vmem:[%s1906_s0 + $0x30] sm:$0xff]  ;;  %vm1084_vm1 = vcmask (%p272_p0), 1041408  }
 0x161   : > { %v1481_v51 = vld [vmem:[#allocation2] sm:$0xff]  ;;  %v1470_v61 = vld [vmem:[%s1802_s4 + $0x8] sm:$0xff]  ;;  %v1494_v2 = vld [vmem:[%s1906_s0 + $0x18] sm:$0xff] }
 0x162   : > { %371 = vmatpush.bf16.msra.mxu0 %v1479_v41  ;;  %v1466_v52 = vld [vmem:[%s1796_s16] sm:$0xff]  ;;  %v1496_v0 = vld [vmem:[%s1906_s0 + $0x28] sm:$0xff]  ;;  %v1493_v3 = vld [vmem:[%s1906_s0 + $0x10] sm:$0xff] }
 0x163   : > { %v1472_v49 = vld [vmem:[#allocation2 + $0x8] sm:$0xff]  ;;  %v1469_v60 = vld [vmem:[%s1802_s4] sm:$0xff]  ;;  %v1484_v28 = vld [vmem:[%s1796_s16 + $0x10] sm:$0xff] }
 0x164   : > { %v1482_v50 = vld [vmem:[#allocation2 + $0x8] sm:$0xff]  ;;  %584 = vmatpush.bf16.msra.mxu3 %v1497_v63  ;;  %v1495_v1 = vld [vmem:[%s1906_s0 + $0x20] sm:$0xff]  ;;  %v1485_v30 = vld [vmem:[%s1796_s16 + $0x18] sm:$0xff] }
 0x165   : > { %464 = vmatpush.bf16.msra.mxu2 %v1482_v50  ;;  %v1492_v4 = vld [vmem:[%s1906_s0 + $0x8] sm:$0xff]  ;;  %v1491_v5 = vld [vmem:[%s1906_s0] sm:$0xff]  ;;  %v1487_v36 = vld [vmem:[%s1802_s4 + $0x10] sm:$0xff] }
 0x166   : > { %372 = vmatpush.bf16.msra.mxu0 %v1478_v42  ;;  %v1488_v37 = vld [vmem:[%s1802_s4 + $0x18] sm:$0xff]  ;;  %v1508_v62 = vld [vmem:[%s1906_s0 + $0x8] sm:$0xff] (%p272_p0)  ;;  %v1507_v63 = vld [vmem:[%s1906_s0] sm:$0xff] (%p272_p0) }
 0x168   : > { %585 = vmatpush.bf16.msra.mxu3 %v1496_v0 }
 0x169   : > { %465 = vmatpush.bf16.msra.mxu2 %v1481_v51 }
 0x16a   : > { %373 = vmatpush.bf16.msra.mxu0 %v1477_v43 }
 0x16c   : > { %1248 = vmatmul.msk.bf16.vlgmr.msra.gmra.mxu2 %vm185_vm0, %v1466_v52  ;;  %586 = vmatpush.bf16.msra.mxu3 %v1495_v1 }
 0x16e   : > { %374 = vmatpush.bf16.msra.mxu0 %v1476_v44 }
 0x170   : > { %587 = vmatpush.bf16.msra.mxu3 %v1494_v2 }
 0x172   : > { %375 = vmatpush.bf16.msra.mxu0 %v1475_v45 }
 0x174   : > { %588 = vmatpush.bf16.msra.mxu3 %v1493_v3 }
 0x176   : > { %376 = vmatpush.bf16.msra.mxu0 %v1474_v46 }
 0x178   : > { %589 = vmatpush.bf16.msra.mxu3 %v1492_v4  ;;  %v1501_v4 = vld [vmem:[#allocation4 + $0x80] sm:$0xff] (%p272_p0) }
 0x17a   : > { %377 = vmatpush.bf16.msra.mxu0 %v1473_v47 }
 0x17c   : > { %1249 = vmatmul.msk.bf16.gmra.mxu2 %vm185_vm0, %v1467_v54  ;;  %590 = vmatpush.bf16.msra.mxu3 %v1491_v5 }
 0x17d   : > { %378 = vmatmul.bf16.vlgmr.msra.gmra.mxu0 %v1471_v48 }
 0x18d   : > { %383 = vmatmul.bf16.gmra.mxu0 %v1472_v49 }
 0x1ef   : > { %v467_v6 = vpop.f32.mrf.mxu2 }
 0x1f7   : > { %v469_v8 = vpop.f32.mrf.mxu2 }
 0x1fa   : > { %v379_v53 = vpop.f32.mrf.mxu0 }
 0x1ff   : > { %v472_v15 = vpop.f32.mrf.mxu2 }
 0x202   : > { %v381_v55 = vpop.f32.mrf.mxu0 }
 0x203   : > { %v393_v59 = vpack.c.bf16 %v381_v55, %v379_v53 }
 0x207   : > { %v474_v19 = vpop.f32.mrf.mxu2 }
 0x20a   : > { %v384_v56 = vpop.f32.mrf.mxu0 }
 0x212   : > { %v386_v57 = vpop.f32.mrf.mxu0 }
 0x213   : > { %v394_v58 = vpack.c.bf16 %v386_v57, %v384_v56  ;;  %v1514_v56 = vld [vmem:[%s1906_s0 + $0x38] sm:$0xff] (%p272_p0)  ;;  %v1513_v57 = vld [vmem:[%s1906_s0 + $0x30] sm:$0xff] (%p272_p0) }
 0x214   :  { %792 = vmatpush.bf16.msra.mxu0 (%p272_p0), %v1514_v56 }
 0x215   : > { %417 = vmatpush.bf16.msra.mxu1 %v394_v58  ;;  %v1512_v58 = vld [vmem:[%s1906_s0 + $0x28] sm:$0xff] (%p272_p0) }
 0x218   :  { %793 = vmatpush.bf16.msra.mxu0 (%p272_p0), %v1513_v57 }
 0x219   : > { %418 = vmatpush.bf16.msra.mxu1 %v393_v59  ;;  %v1511_v59 = vld [vmem:[%s1906_s0 + $0x20] sm:$0xff] (%p272_p0) }
 0x21c   : > { %1230 = vmatmul.msk.bf16.vlgmr.msra.gmra.mxu1 %vm185_vm0, %v1469_v60  ;;  %794 = vmatpush.bf16.msra.mxu0 (%p272_p0), %v1512_v58  ;;  %v1510_v60 = vld [vmem:[%s1906_s0 + $0x18] sm:$0xff] (%p272_p0) }
 0x220   :  { %795 = vmatpush.bf16.msra.mxu0 (%p272_p0), %v1511_v59 }
 0x224   :  { %796 = vmatpush.bf16.msra.mxu0 (%p272_p0), %v1510_v60 }
 0x22c   : > { %1231 = vmatmul.msk.bf16.gmra.mxu1 %vm185_vm0, %v1470_v61  ;;  %v1509_v61 = vld [vmem:[%s1906_s0 + $0x10] sm:$0xff] (%p272_p0) }
 0x22d   :  { %797 = vmatpush.bf16.msra.mxu0 (%p272_p0), %v1509_v61 }
 0x231   :  { %798 = vmatpush.bf16.msra.mxu0 (%p272_p0), %v1508_v62 }
 0x235   :  { %799 = vmatpush.bf16.msra.mxu0 (%p272_p0), %v1507_v63 }
 0x299   : > { %v420_v7 = vpop.f32.mrf.mxu1 }
 0x29a   : > { %v468_v9 = vadd.f32 %v467_v6, %v420_v7  ;;  %v1502_v6 = vld [vmem:[#allocation4 + $0x88] sm:$0xff] (%p272_p0) }
 0x29c   : > { %v477_v12 = vmax.f32 %v468_v9, 0.0 }
 0x2a1   : > { %v422_v10 = vpop.f32.mrf.mxu1 }
 0x2a2   : > { %v470_v11 = vadd.f32 %v469_v8, %v422_v10 }
 0x2a4   : > { %v478_v13 = vmax.f32 %v470_v11, 0.0 }
 0x2a6   : > { %v1542_v14 = vpack.c.bf16 %v478_v13, %v477_v12  ;;  %v1503_v12 = vld [vmem:[#allocation6 + $0x80] sm:$0xff] (%p272_p0)  ;;  %v1504_v13 = vld [vmem:[#allocation6 + $0x88] sm:$0xff] (%p272_p0) }
 0x2a8   : > { %1543 = vst [vmem:[#allocation3 + $0x8] sm:$0xff] %v1542_v14   ;;  %v1526_v14 = vld [vmem:[%s1906_s0 + $0x38] sm:$0xff] (%p272_p0) }
 0x2a9   : > { %v425_v16 = vpop.f32.mrf.mxu1 }
 0x2aa   : > { %v473_v18 = vadd.f32 %v472_v15, %v425_v16  ;;  %v1525_v15 = vld [vmem:[%s1906_s0 + $0x30] sm:$0xff] (%p272_p0)  ;;  %v1524_v16 = vld [vmem:[%s1906_s0 + $0x28] sm:$0xff] (%p272_p0) }
 0x2ac   : > { %v479_v22 = vmax.f32 %v473_v18, 0.0  ;;  %v1522_v18 = vld [vmem:[%s1906_s0 + $0x18] sm:$0xff] (%p272_p0) }
 0x2af   : > { %v1489_v17 = vld [vmem:[#allocation3 + $0x8] sm:$0xff] }
 0x2b0   : > { %591 = vmatmul.bf16.vlgmr.msra.gmra.mxu3 %v1489_v17  ;;  %v1499_v27 = vld [vmem:[#allocation3 + $0x8] sm:$0xff]  ;;  %v1523_v17 = vld [vmem:[%s1906_s0 + $0x20] sm:$0xff] (%p272_p0) }
 0x2b1   : > { %v427_v20 = vpop.f32.mrf.mxu1  ;;  %993 = vmatpush.bf16.msra.mxu3 (%p272_p0), %v1526_v14 }
 0x2b2   : > { %v475_v21 = vadd.f32 %v474_v19, %v427_v20  ;;  %v1521_v19 = vld [vmem:[%s1906_s0 + $0x10] sm:$0xff] (%p272_p0)  ;;  %v1520_v20 = vld [vmem:[%s1906_s0 + $0x8] sm:$0xff] (%p272_p0) }
 0x2b4   : > { %v480_v23 = vmax.f32 %v475_v21, 0.0  ;;  %v1519_v21 = vld [vmem:[%s1906_s0] sm:$0xff] (%p272_p0) }
 0x2b5   :  { %994 = vmatpush.bf16.msra.mxu3 (%p272_p0), %v1525_v15 }
 0x2b6   : > { %v1547_v24 = vpack.c.bf16 %v480_v23, %v479_v22 }
 0x2b8   : > { %1570 = vst [vmem:[#allocation3] sm:$0xff] %v1547_v24  }
 0x2b9   :  { %995 = vmatpush.bf16.msra.mxu3 (%p272_p0), %v1524_v16 }
 0x2bd   :  { %996 = vmatpush.bf16.msra.mxu3 (%p272_p0), %v1523_v17 }
 0x2bf   : > { %v1490_v25 = vld [vmem:[#allocation3] sm:$0xff] }
 0x2c0   : > { %v1500_v26 = vld [vmem:[#allocation3] sm:$0xff]  ;;  %596 = vmatmul.bf16.gmra.mxu3 %v1490_v25 }
 0x2c1   : > { %677 = vmatpush.bf16.msrb.mxu2 %v1500_v26  ;;  %997 = vmatpush.bf16.msra.mxu3 (%p272_p0), %v1522_v18 }
 0x2c5   : > { %678 = vmatpush.bf16.msrb.mxu2 %v1499_v27  ;;  %998 = vmatpush.bf16.msra.mxu3 (%p272_p0), %v1521_v19 }
 0x2c8   : > { %1328 = vmatmul.msk.bf16.vlgmr.msrb.gmra.mxu2 %vm185_vm0, %v1484_v28 }
 0x2c9   :  { %999 = vmatpush.bf16.msra.mxu3 (%p272_p0), %v1520_v20 }
 0x2cd   :  { %1000 = vmatpush.bf16.msra.mxu3 (%p272_p0), %v1519_v21 }
 0x2d8   : > { %1329 = vmatmul.msk.bf16.gmra.mxu2 %vm185_vm0, %v1485_v30 }
 0x333   : > { %v592_v29 = vpop.f32.mrf.mxu3 }
 0x33b   : > { %v594_v31 = vpop.f32.mrf.mxu3 }
 0x33c   : > { %v606_v35 = vpack.c.bf16 %v594_v31, %v592_v29 }
 0x343   : > { %v597_v32 = vpop.f32.mrf.mxu3 }
 0x34b   : > { %v599_v33 = vpop.f32.mrf.mxu3  ;;  %v680_v38 = vpop.f32.mrf.mxu2 }
 0x34c   : > { %v607_v34 = vpack.c.bf16 %v599_v33, %v597_v32 }
 0x34e   : > { %630 = vmatpush.bf16.msrb.mxu1 %v607_v34 }
 0x352   : > { %631 = vmatpush.bf16.msrb.mxu1 %v606_v35 }
 0x353   : > { %v682_v40 = vpop.f32.mrf.mxu2 }
 0x355   : > { %1310 = vmatmul.msk.bf16.vlgmr.msrb.gmra.mxu1 %vm185_vm0, %v1487_v36 }
 0x35b   : > { %v685_v47 = vpop.f32.mrf.mxu2 }
 0x363   : > { %v687_v51 = vpop.f32.mrf.mxu2 }
 0x365   : > { %1311 = vmatmul.msk.bf16.gmra.mxu1 %vm185_vm0, %v1488_v37 }
 0x3d2   : > { %v633_v39 = vpop.f32.mrf.mxu1 }
 0x3d3   : > { %v681_v41 = vadd.f32 %v680_v38, %v633_v39 }
 0x3d5   : > { %v690_v44 = vmax.f32 %v681_v41, 0.0 }
 0x3da   : > { %v635_v42 = vpop.f32.mrf.mxu1 }
 0x3db   : > { %v683_v43 = vadd.f32 %v682_v40, %v635_v42 }
 0x3dd   : > { %v691_v45 = vmax.f32 %v683_v43, 0.0 }
 0x3df   : > { %v1552_v46 = vpack.c.bf16 %v691_v45, %v690_v44  ;;  %v911_v44 = vld [vmem:[%s1912_s6] sm:$0xf] (%p272_p0) }
 0x3e1   : > { %1553 = vst [vmem:[#allocation2] sm:$0xff] %v1552_v46  }
 0x3e2   : > { %v638_v48 = vpop.f32.mrf.mxu1 }
 0x3e3   : > { %v686_v49 = vadd.f32 %v685_v47, %v638_v48 }
 0x3e5   : > { %v692_v53 = vmax.f32 %v686_v49, 0.0 }
 0x3e8   :  { %v1505_v0 = vld [vmem:[#allocation2] sm:$0xff] (%p272_p0) }
 0x3e9   :  { %800 = vmatmul.bf16.vlgmr.msra.gmra.mxu0 (%p272_p0), %v1505_v0  ;;  %v1515_v3 = vld [vmem:[#allocation2] sm:$0xff] (%p272_p0) }
 0x3ea   : > { %v640_v50 = vpop.f32.mrf.mxu1 }
 0x3eb   : > { %v688_v52 = vadd.f32 %v687_v51, %v640_v50  ;;  %v912_v51 = vld [vmem:[%s1913_s7] sm:$0xf] (%p272_p0) }
 0x3ed   : > { %v693_v54 = vmax.f32 %v688_v52, 0.0  ;;  %274 = sbr.rel (!%p272_p0) target bundleno = 349 (0x15d), region = 73 }
 0x3ef   : > { %v1557_v55 = vpack.c.bf16 %v693_v54, %v692_v53 }
 0x3f1   : > { %1571 = vst [vmem:[#allocation2 + $0x8] sm:$0xff] %v1557_v55  }
 0x3f8   :  { %v1506_v1 = vld [vmem:[#allocation2 + $0x8] sm:$0xff] }
 0x3f9   :  { %805 = vmatmul.bf16.gmra.mxu0 %v1506_v1  ;;  %v1516_v2 = vld [vmem:[#allocation2 + $0x8] sm:$0xff] }
 0x3fa   :  { %886 = vmatpush.bf16.msra.mxu2 %v1516_v2 }
 0x3fe   :  { %887 = vmatpush.bf16.msra.mxu2 %v1515_v3 }
 0x401   :  { %1396 = vmatmul.msk.bf16.vlgmr.msra.gmra.mxu2 %vm185_vm0, %v1501_v4 }
 0x411   :  { %1397 = vmatmul.msk.bf16.gmra.mxu2 %vm185_vm0, %v1502_v6 }
 0x466   :  { %v801_v5 = vpop.f32.mrf.mxu0 }
 0x46e   :  { %v803_v7 = vpop.f32.mrf.mxu0 }
 0x46f   :  { %v815_v11 = vpack.c.bf16 %v803_v7, %v801_v5 }
 0x476   :  { %v806_v8 = vpop.f32.mrf.mxu0 }
 0x47e   :  { %v808_v9 = vpop.f32.mrf.mxu0 }
 0x47f   :  { %v816_v10 = vpack.c.bf16 %v808_v9, %v806_v8 }
 0x481   :  { %839 = vmatpush.bf16.msra.mxu1 %v816_v10 }
 0x484   :  { %v889_v22 = vpop.f32.mrf.mxu2 }
 0x485   :  { %840 = vmatpush.bf16.msra.mxu1 %v815_v11 }
 0x488   :  { %1378 = vmatmul.msk.bf16.vlgmr.msra.gmra.mxu1 %vm185_vm0, %v1503_v12 }
 0x48c   :  { %v891_v24 = vpop.f32.mrf.mxu2 }
 0x494   :  { %v894_v31 = vpop.f32.mrf.mxu2 }
 0x498   :  { %1379 = vmatmul.msk.bf16.gmra.mxu1 %vm185_vm0, %v1504_v13 }
 0x49c   :  { %v896_v35 = vpop.f32.mrf.mxu2 }
 0x505   :  { %v842_v23 = vpop.f32.mrf.mxu1 }
 0x506   :  { %v890_v25 = vadd.f32 %v889_v22, %v842_v23 }
 0x508   :  { %v899_v28 = vmax.f32 %v890_v25, 0.0 }
 0x50d   :  { %v844_v26 = vpop.f32.mrf.mxu1 }
 0x50e   :  { %v892_v27 = vadd.f32 %v891_v24, %v844_v26 }
 0x510   :  { %v900_v29 = vmax.f32 %v892_v27, 0.0 }
 0x512   :  { %v1562_v30 = vpack.c.bf16 %v900_v29, %v899_v28 }
 0x514   :  { %1563 = vst [vmem:[#allocation3 + $0x8] sm:$0xff] %v1562_v30  }
 0x515   :  { %v847_v32 = vpop.f32.mrf.mxu1 }
 0x516   :  { %v895_v34 = vadd.f32 %v894_v31, %v847_v32 }
 0x518   :  { %v901_v38 = vmax.f32 %v895_v34, 0.0 }
 0x51b   :  { %v1517_v33 = vld [vmem:[#allocation3 + $0x8] sm:$0xff] }
 0x51c   :  { %1001 = vmatmul.bf16.vlgmr.msra.gmra.mxu3 %v1517_v33  ;;  %v1527_v43 = vld [vmem:[#allocation3 + $0x8] sm:$0xff] }
 0x51d   :  { %v849_v36 = vpop.f32.mrf.mxu1 }
 0x51e   :  { %v897_v37 = vadd.f32 %v896_v35, %v849_v36 }
 0x520   :  { %v902_v39 = vmax.f32 %v897_v37, 0.0 }
 0x522   :  { %v1567_v40 = vpack.c.bf16 %v902_v39, %v901_v38 }
 0x524   :  { %1572 = vst [vmem:[#allocation3] sm:$0xff] %v1567_v40  }
 0x52b   :  { %v1518_v41 = vld [vmem:[#allocation3] sm:$0xff] }
 0x52c   :  { %v1528_v42 = vld [vmem:[#allocation3] sm:$0xff]  ;;  %1006 = vmatmul.bf16.gmra.mxu3 %v1518_v41 }
 0x52d   :  { %1055 = vmatpush.bf16.msrb.mxu2 %v1528_v42 }
 0x531   :  { %1056 = vmatpush.bf16.msrb.mxu2 %v1527_v43 }
 0x534   :  { %1447 = vmatmul.msk.bf16.vlgmr.msrb.gmra.mxu2 %vm185_vm0, %v911_v44 }
 0x59f   :  { %v1002_v45 = vpop.f32.mrf.mxu3 }
 0x5a7   :  { %v1004_v46 = vpop.f32.mrf.mxu3 }
 0x5a8   :  { %v1016_v50 = vpack.c.bf16 %v1004_v46, %v1002_v45 }
 0x5af   :  { %v1007_v47 = vpop.f32.mrf.mxu3 }
 0x5b7   :  { %v1009_v48 = vpop.f32.mrf.mxu3  ;;  %v1058_v52 = vpop.f32.mrf.mxu2 }
 0x5b8   :  { %v1017_v49 = vpack.c.bf16 %v1009_v48, %v1007_v47 }
 0x5ba   :  { %1027 = vmatpush.bf16.msrb.mxu1 %v1017_v49 }
 0x5be   :  { %1028 = vmatpush.bf16.msrb.mxu1 %v1016_v50 }
 0x5bf   :  { %v1060_v53 = vpop.f32.mrf.mxu2 }
 0x5c1   :  { %1438 = vmatmul.msk.bf16.vlgmr.msrb.gmra.mxu1 %vm185_vm0, %v912_v51 }
 0x63e   :  { %v1030_v54 = vpop.f32.mrf.mxu1 }
 0x63f   :  { %v1059_v55 = vadd.f32 %v1058_v52, %v1030_v54 }
 0x641   :  { %v1063_v56 = vrot.slane %v1059_v55, 1 }
 0x643   :  { %v1065_v57 = vmax.f32 %v1059_v55, %v1063_v56 }
 0x645   :  { %v1066_v58 = vsub.f32 %v1059_v55, %v1065_v57  ;;  %v1070_v59 = vrot.slane %v1065_v57, 7 }
 0x646   :  { %v1032_v60 = vpop.f32.mrf.mxu1 }
 0x647   :  { %v1072_v61 = vsub.f32 %v1059_v55, %v1070_v59  ;;  %v1067_v62 = vmul.f32 1.442695, %v1066_v58 }
 0x649   :  { %v1073_v63 = vmul.f32 1.442695, %v1072_v61 }
 0x64b   :  { %1593 = vpow2.f32 %v1073_v63 }
 0x64c   :  { %1595 = vpow2.f32 %v1067_v62 }
 0x651   :  { %v1594_v0 = vpop.eup %1593 }
 0x652   :  { %v1076_v1 = vrot.slane %v1594_v0, 1  ;;  %v1596_v2 = vpop.eup %1595 }
 0x654   :  { %v1078_v3 = vadd.f32 %v1596_v2, %v1076_v1 }
 0x656   :  { %1597 = vlog2.f32 %v1078_v3 }
 0x65c   :  { %v1598_v4 = vpop.eup %1597 }
 0x65d   :  { %v1080_v5 = vmul.f32 0.6931472, %v1598_v4 }
 0x65f   :  { %v1081_v6 = vadd.f32 %v1080_v5, %v1065_v57 }
 0x661   :  { %v1082_v7 = vperm.slane %v1081_v6, 0 }
 0x663   :  { %v1083_v8 = vsub.f32 %v1059_v55, %v1082_v7 }
 0x665   :  { %v1085_v9 = vsel %vm1084_vm1, %v1083_v8, 0.0 }
 0x666   :  { %1086 = vst [vmem:[%s1914_s8] sm:$0xff] %v1085_v9 }
 0x667   :  { %1091 = vsyncpa [#allocation5], 1 }
 0x668   :  { %1092 = vsyncpa [#allocation7], 1 }

</bundles_post_ra>
